<compile_context>
chip_gen: v7x
topology: tpu7x:2x2x1
jax: 0.10.0
libtpu: 0.0.40
codegen_flags: <defaults>
</compile_context>

<pallas_src>
import functools

import jax
import jax.numpy as jnp
from jax import lax
from jax.experimental import pallas as pl
from jax.experimental.pallas import tpu as pltpu


def _featnet_kernel(x_ref, w1_ref, b1_ref, w2_ref, b2_ref, m_ref, o_ref, *,
                    width):
    # x_ref : (Cin_p, HW)    one batch element, channels on sublanes, HW on lanes
    # w1_ref: (C1, 9*Cin_p)  conv1 weights, tap-major / channel-minor columns
    # b1_ref: (C1, 1)
    # w2_ref: (C2, 9*C1)     conv2 weights, same packing
    # b2_ref: (C2, 1)
    # m_ref : (9, HW)        per-tap validity masks over the flattened H*W axis
    # o_ref : (C2, HW)       lane-dense output block (NCHW flatten order)
    _, hw = x_ref.shape
    W = width

    def shifted_taps(act):
        """act (C, HW) -> (9*C, HW): 3x3 taps as lane rolls, stacked on sublanes."""
        pieces = []
        for dy in range(3):
            for dx in range(3):
                tap = dy * 3 + dx
                off = (dy - 1) * W + (dx - 1)          # static Python int
                if off == 0:
                    pieces.append(act)                 # center tap: identity, no halo
                    continue
                # result[p] = act[p + off]  (circular), then zero the halo lanes
                rolled = pltpu.roll(act, shift=(-off) % hw, axis=1)
                pieces.append(rolled * m_ref[tap:tap + 1, :])
            # (boundary masks are shared by both convs; loaded as (1, HW) slices)
        return jnp.concatenate(pieces, axis=0)         # tile-aligned sublane concat

    # conv1 + bias + ReLU : (C1, 9*Cin_p) @ (9*Cin_p, HW) -> (C1, HW)
    p1 = shifted_taps(x_ref[...])
    h1 = lax.dot_general(w1_ref[...], p1, (((1,), (0,)), ((), ())),
                         preferred_element_type=jnp.float32)
    h1 = jnp.maximum(h1 + b1_ref[...], 0.0)

    # conv2 + bias + ReLU : (C2, 9*C1) @ (9*C1, HW) -> (C2, HW)
    p2 = shifted_taps(h1)
    h2 = lax.dot_general(w2_ref[...], p2, (((1,), (0,)), ((), ())),
                         preferred_element_type=jnp.float32)
    h2 = jnp.maximum(h2 + b2_ref[...], 0.0)

    # Single lane-dense store; (C2, HW) is already NCHW-flatten order.
    o_ref[...] = h2.astype(o_ref.dtype)


@jax.jit
def featnet_forward(x_nchw, params):
    """FeatNet.forward: conv1-relu-conv2-relu, then .view(B, -1) (NCHW order)."""
    w1, b1, w2, b2 = params
    B, Cin, H, W = x_nchw.shape
    C1 = w1.shape[-1]
    C2 = w2.shape[-1]
    HW = H * W
    cin_p = ((Cin + 7) // 8) * 8          # pad input channels to the sublane tile

    # Channels-first, spatial flattened onto lanes: (B, Cin_p, HW).  No transpose
    # needed relative to PyTorch NCHW.
    x3 = x_nchw.reshape(B, Cin, HW)
    if cin_p != Cin:
        x3 = jnp.pad(x3, ((0, 0), (0, cin_p - Cin), (0, 0)))

    # Flatten weights so each conv is a single K = 9*C_in matmul.
    # w1f[c1, (dy*3+dx)*cin_p + cin] = w1[dy, dx, cin, c1]
    w1p = jnp.pad(w1, ((0, 0), (0, 0), (0, cin_p - Cin), (0, 0)))
    w1f = jnp.transpose(w1p, (3, 0, 1, 2)).reshape(C1, 9 * cin_p)
    w2f = jnp.transpose(w2, (3, 0, 1, 2)).reshape(C2, 9 * C1)
    b1c = b1.reshape(C1, 1)
    b2c = b2.reshape(C2, 1)

    # 9 boundary masks over the flattened H*W axis (valid iff the tap's source
    # pixel is inside the image).  Shared by both conv layers.
    hh = jnp.arange(HW, dtype=jnp.int32) // W
    ww = jnp.arange(HW, dtype=jnp.int32) % W
    masks = []
    for dy in range(3):
        for dx in range(3):
            ok_h = (hh + (dy - 1) >= 0) & (hh + (dy - 1) < H)
            ok_w = (ww + (dx - 1) >= 0) & (ww + (dx - 1) < W)
            masks.append((ok_h & ok_w).astype(jnp.float32))
    masks = jnp.stack(masks, axis=0)      # (9, HW)

    out3 = pl.pallas_call(
        functools.partial(_featnet_kernel, width=W),
        out_shape=jax.ShapeDtypeStruct((B, C2, HW), jnp.float32),
        grid=(B,),
        in_specs=[
            pl.BlockSpec((None, cin_p, HW), lambda b: (b, 0, 0)),
            pl.BlockSpec((C1, 9 * cin_p), lambda b: (0, 0)),
            pl.BlockSpec((C1, 1), lambda b: (0, 0)),
            pl.BlockSpec((C2, 9 * C1), lambda b: (0, 0)),
            pl.BlockSpec((C2, 1), lambda b: (0, 0)),
            pl.BlockSpec((9, HW), lambda b: (0, 0)),
        ],
        out_specs=pl.BlockSpec((None, C2, HW), lambda b: (b, 0, 0)),
        compiler_params=pltpu.CompilerParams(
            dimension_semantics=("parallel",)),
    )(x3, w1f, b1c, w2f, b2c, masks)

    # (B, C2, H*W) is already the PyTorch NCHW .view(B, -1) order -> free reshape.
    return out3.reshape(B, -1)


def init_params(key, cin=4, c1=8, c2=16):
    k1, k2, k3, k4 = jax.random.split(key, 4)
    w1 = jax.random.normal(k1, (3, 3, cin, c1), jnp.float32) * 0.1
    b1 = jax.random.normal(k2, (c1,), jnp.float32) * 0.1
    w2 = jax.random.normal(k3, (3, 3, c1, c2), jnp.float32) * 0.1
    b2 = jax.random.normal(k4, (c2,), jnp.float32) * 0.1
    return w1, b1, w2, b2


def featnet_reference(x_nchw, params):
    """Pure-JAX reference (matches PyTorch Conv2d padding=1 semantics)."""
    w1, b1, w2, b2 = params
    dn = ("NCHW", "HWIO", "NCHW")
    h = lax.conv_general_dilated(x_nchw, w1, (1, 1), ((1, 1), (1, 1)),
                                 dimension_numbers=dn)
    h = jnp.maximum(h + b1[None, :, None, None], 0.0)
    h = lax.conv_general_dilated(h, w2, (1, 1), ((1, 1), (1, 1)),
                                 dimension_numbers=dn)
    h = jnp.maximum(h + b2[None, :, None, None], 0.0)
    return h.reshape(x_nchw.shape[0], -1)


if __name__ == "__main__":
    key = jax.random.PRNGKey(0)
    kx, kp = jax.random.split(key)

    B, C, H, W = 2, 4, 16, 16
    x = jax.random.normal(kx, (B, C, H, W), jnp.float32)   # NCHW, like PyTorch
    params = init_params(kp, cin=C, c1=8, c2=16)

    out = featnet_forward(x, params)
    out = jax.block_until_ready(out)

    ref = featnet_reference(x, params)
    assert out.shape == (B, 16 * H * W), out.shape
    assert jnp.allclose(out, ref, atol=2e-4, rtol=2e-4), "mismatch vs reference"

    print("KERNEL_OK")
</pallas_src>

<mosaic_0001>
module attributes {stable_mosaic.version = 11 : i64} {
  func.func @_featnet_kernel(%arg0: i32, %arg1: memref<1x8x256xf32, #tpu.memory_space<vmem>>, %arg2: memref<8x72xf32, #tpu.memory_space<vmem>>, %arg3: memref<8x1xf32, #tpu.memory_space<vmem>>, %arg4: memref<16x72xf32, #tpu.memory_space<vmem>>, %arg5: memref<16x1xf32, #tpu.memory_space<vmem>>, %arg6: memref<9x256xf32, #tpu.memory_space<vmem>>, %arg7: memref<1x16x256xf32, #tpu.memory_space<vmem>>) attributes {dimension_semantics = [#tpu.dimension_semantics<parallel>], iteration_bounds = array<i64: 2>, scalar_prefetch = 0 : i64, scratch_operands = 0 : i64, tpu.core_type = #tpu.core_type<tc>, window_params = [{transform_indices = @transform_0, window_bounds = array<i64: 1, 8, 256>}, {pipeline_mode = #tpu.pipeline_mode<synchronous>, transform_indices = @transform_1, window_bounds = array<i64: 8, 72>}, {pipeline_mode = #tpu.pipeline_mode<synchronous>, transform_indices = @transform_2, window_bounds = array<i64: 8, 1>}, {pipeline_mode = #tpu.pipeline_mode<synchronous>, transform_indices = @transform_3, window_bounds = array<i64: 16, 72>}, {pipeline_mode = #tpu.pipeline_mode<synchronous>, transform_indices = @transform_4, window_bounds = array<i64: 16, 1>}, {pipeline_mode = #tpu.pipeline_mode<synchronous>, transform_indices = @transform_5, window_bounds = array<i64: 9, 256>}, {transform_indices = @transform_6, window_bounds = array<i64: 1, 16, 256>}]} {
    %c0 = arith.constant 0 : index
    %c0_0 = arith.constant 0 : index
    %c0_1 = arith.constant 0 : index
    %0 = vector.load %arg1[%c0, %c0_0, %c0_1] : memref<1x8x256xf32, #tpu.memory_space<vmem>>, vector<1x8x256xf32>
    %1 = vector.shape_cast %0 : vector<1x8x256xf32> to vector<8x256xf32>
    %c17_i32 = arith.constant 17 : i32
    %2 = tpu.dynamic_rotate %1 by %c17_i32 dim 1 : vector<8x256xf32>, i32 -> vector<8x256xf32>
    %c0_2 = arith.constant 0 : index
    %c0_3 = arith.constant 0 : index
    %3 = vector.load %arg6[%c0_2, %c0_3] : memref<9x256xf32, #tpu.memory_space<vmem>>, vector<1x256xf32>
    %4 = vector.broadcast %3 : vector<1x256xf32> to vector<8x256xf32>
    %5 = arith.mulf %2, %4 : vector<8x256xf32>
    %c16_i32 = arith.constant 16 : i32
    %6 = tpu.dynamic_rotate %1 by %c16_i32 dim 1 : vector<8x256xf32>, i32 -> vector<8x256xf32>
    %c1 = arith.constant 1 : index
    %c0_4 = arith.constant 0 : index
    %7 = vector.load %arg6[%c1, %c0_4] : memref<9x256xf32, #tpu.memory_space<vmem>>, vector<1x256xf32>
    %8 = vector.broadcast %7 : vector<1x256xf32> to vector<8x256xf32>
    %9 = arith.mulf %6, %8 : vector<8x256xf32>
    %c15_i32 = arith.constant 15 : i32
    %10 = tpu.dynamic_rotate %1 by %c15_i32 dim 1 : vector<8x256xf32>, i32 -> vector<8x256xf32>
    %c2 = arith.constant 2 : index
    %c0_5 = arith.constant 0 : index
    %11 = vector.load %arg6[%c2, %c0_5] : memref<9x256xf32, #tpu.memory_space<vmem>>, vector<1x256xf32>
    %12 = vector.broadcast %11 : vector<1x256xf32> to vector<8x256xf32>
    %13 = arith.mulf %10, %12 : vector<8x256xf32>
    %c1_i32 = arith.constant 1 : i32
    %14 = tpu.dynamic_rotate %1 by %c1_i32 dim 1 : vector<8x256xf32>, i32 -> vector<8x256xf32>
    %c3 = arith.constant 3 : index
    %c0_6 = arith.constant 0 : index
    %15 = vector.load %arg6[%c3, %c0_6] : memref<9x256xf32, #tpu.memory_space<vmem>>, vector<1x256xf32>
    %16 = vector.broadcast %15 : vector<1x256xf32> to vector<8x256xf32>
    %17 = arith.mulf %14, %16 : vector<8x256xf32>
    %c255_i32 = arith.constant 255 : i32
    %18 = tpu.dynamic_rotate %1 by %c255_i32 dim 1 : vector<8x256xf32>, i32 -> vector<8x256xf32>
    %c5 = arith.constant 5 : index
    %c0_7 = arith.constant 0 : index
    %19 = vector.load %arg6[%c5, %c0_7] : memref<9x256xf32, #tpu.memory_space<vmem>>, vector<1x256xf32>
    %20 = vector.broadcast %19 : vector<1x256xf32> to vector<8x256xf32>
    %21 = arith.mulf %18, %20 : vector<8x256xf32>
    %c241_i32 = arith.constant 241 : i32
    %22 = tpu.dynamic_rotate %1 by %c241_i32 dim 1 : vector<8x256xf32>, i32 -> vector<8x256xf32>
    %c6 = arith.constant 6 : index
    %c0_8 = arith.constant 0 : index
    %23 = vector.load %arg6[%c6, %c0_8] : memref<9x256xf32, #tpu.memory_space<vmem>>, vector<1x256xf32>
    %24 = vector.broadcast %23 : vector<1x256xf32> to vector<8x256xf32>
    %25 = arith.mulf %22, %24 : vector<8x256xf32>
    %c240_i32 = arith.constant 240 : i32
    %26 = tpu.dynamic_rotate %1 by %c240_i32 dim 1 : vector<8x256xf32>, i32 -> vector<8x256xf32>
    %c7 = arith.constant 7 : index
    %c0_9 = arith.constant 0 : index
    %27 = vector.load %arg6[%c7, %c0_9] : memref<9x256xf32, #tpu.memory_space<vmem>>, vector<1x256xf32>
    %28 = vector.broadcast %27 : vector<1x256xf32> to vector<8x256xf32>
    %29 = arith.mulf %26, %28 : vector<8x256xf32>
    %c239_i32 = arith.constant 239 : i32
    %30 = tpu.dynamic_rotate %1 by %c239_i32 dim 1 : vector<8x256xf32>, i32 -> vector<8x256xf32>
    %c8 = arith.constant 8 : index
    %c0_10 = arith.constant 0 : index
    %31 = vector.load %arg6[%c8, %c0_10] : memref<9x256xf32, #tpu.memory_space<vmem>>, vector<1x256xf32>
    %32 = vector.broadcast %31 : vector<1x256xf32> to vector<8x256xf32>
    %33 = arith.mulf %30, %32 : vector<8x256xf32>
    %34 = tpu.concatenate %5, %9, %13, %17, %1, %21, %25, %29, %33 in 0 : vector<8x256xf32>, vector<8x256xf32>, vector<8x256xf32>, vector<8x256xf32>, vector<8x256xf32>, vector<8x256xf32>, vector<8x256xf32>, vector<8x256xf32>, vector<8x256xf32> -> vector<72x256xf32>
    %c0_11 = arith.constant 0 : index
    %c0_12 = arith.constant 0 : index
    %35 = vector.load %arg2[%c0_11, %c0_12] : memref<8x72xf32, #tpu.memory_space<vmem>>, vector<8x72xf32>
    %cst = arith.constant dense<0.000000e+00> : vector<8x256xf32>
    %36 = tpu.matmul %35, %34, %cst {dimension_numbers = #tpu.dot_dimension_numbers<[1], [0], [0], [1], [0, 0, 1, 1], [], []>} : vector<8x72xf32>, vector<72x256xf32>, vector<8x256xf32> -> vector<8x256xf32>
    %c0_13 = arith.constant 0 : index
    %c0_14 = arith.constant 0 : index
    %37 = vector.load %arg3[%c0_13, %c0_14] : memref<8x1xf32, #tpu.memory_space<vmem>>, vector<8x1xf32>
    %38 = vector.broadcast %37 : vector<8x1xf32> to vector<8x256xf32>
    %39 = arith.addf %36, %38 : vector<8x256xf32>
    %cst_15 = arith.constant 0.000000e+00 : f32
    %40 = vector.broadcast %cst_15 : f32 to vector<8x256xf32>
    %41 = arith.maximumf %39, %40 : vector<8x256xf32>
    %c17_i32_16 = arith.constant 17 : i32
    %42 = tpu.dynamic_rotate %41 by %c17_i32_16 dim 1 : vector<8x256xf32>, i32 -> vector<8x256xf32>
    %c0_17 = arith.constant 0 : index
    %c0_18 = arith.constant 0 : index
    %43 = vector.load %arg6[%c0_17, %c0_18] : memref<9x256xf32, #tpu.memory_space<vmem>>, vector<1x256xf32>
    %44 = vector.broadcast %43 : vector<1x256xf32> to vector<8x256xf32>
    %45 = arith.mulf %42, %44 : vector<8x256xf32>
    %c16_i32_19 = arith.constant 16 : i32
    %46 = tpu.dynamic_rotate %41 by %c16_i32_19 dim 1 : vector<8x256xf32>, i32 -> vector<8x256xf32>
    %c1_20 = arith.constant 1 : index
    %c0_21 = arith.constant 0 : index
    %47 = vector.load %arg6[%c1_20, %c0_21] : memref<9x256xf32, #tpu.memory_space<vmem>>, vector<1x256xf32>
    %48 = vector.broadcast %47 : vector<1x256xf32> to vector<8x256xf32>
    %49 = arith.mulf %46, %48 : vector<8x256xf32>
    %c15_i32_22 = arith.constant 15 : i32
    %50 = tpu.dynamic_rotate %41 by %c15_i32_22 dim 1 : vector<8x256xf32>, i32 -> vector<8x256xf32>
    %c2_23 = arith.constant 2 : index
    %c0_24 = arith.constant 0 : index
    %51 = vector.load %arg6[%c2_23, %c0_24] : memref<9x256xf32, #tpu.memory_space<vmem>>, vector<1x256xf32>
    %52 = vector.broadcast %51 : vector<1x256xf32> to vector<8x256xf32>
    %53 = arith.mulf %50, %52 : vector<8x256xf32>
    %c1_i32_25 = arith.constant 1 : i32
    %54 = tpu.dynamic_rotate %41 by %c1_i32_25 dim 1 : vector<8x256xf32>, i32 -> vector<8x256xf32>
    %c3_26 = arith.constant 3 : index
    %c0_27 = arith.constant 0 : index
    %55 = vector.load %arg6[%c3_26, %c0_27] : memref<9x256xf32, #tpu.memory_space<vmem>>, vector<1x256xf32>
    %56 = vector.broadcast %55 : vector<1x256xf32> to vector<8x256xf32>
    %57 = arith.mulf %54, %56 : vector<8x256xf32>
    %c255_i32_28 = arith.constant 255 : i32
    %58 = tpu.dynamic_rotate %41 by %c255_i32_28 dim 1 : vector<8x256xf32>, i32 -> vector<8x256xf32>
    %c5_29 = arith.constant 5 : index
    %c0_30 = arith.constant 0 : index
    %59 = vector.load %arg6[%c5_29, %c0_30] : memref<9x256xf32, #tpu.memory_space<vmem>>, vector<1x256xf32>
    %60 = vector.broadcast %59 : vector<1x256xf32> to vector<8x256xf32>
    %61 = arith.mulf %58, %60 : vector<8x256xf32>
    %c241_i32_31 = arith.constant 241 : i32
    %62 = tpu.dynamic_rotate %41 by %c241_i32_31 dim 1 : vector<8x256xf32>, i32 -> vector<8x256xf32>
    %c6_32 = arith.constant 6 : index
    %c0_33 = arith.constant 0 : index
    %63 = vector.load %arg6[%c6_32, %c0_33] : memref<9x256xf32, #tpu.memory_space<vmem>>, vector<1x256xf32>
    %64 = vector.broadcast %63 : vector<1x256xf32> to vector<8x256xf32>
    %65 = arith.mulf %62, %64 : vector<8x256xf32>
    %c240_i32_34 = arith.constant 240 : i32
    %66 = tpu.dynamic_rotate %41 by %c240_i32_34 dim 1 : vector<8x256xf32>, i32 -> vector<8x256xf32>
    %c7_35 = arith.constant 7 : index
    %c0_36 = arith.constant 0 : index
    %67 = vector.load %arg6[%c7_35, %c0_36] : memref<9x256xf32, #tpu.memory_space<vmem>>, vector<1x256xf32>
    %68 = vector.broadcast %67 : vector<1x256xf32> to vector<8x256xf32>
    %69 = arith.mulf %66, %68 : vector<8x256xf32>
    %c239_i32_37 = arith.constant 239 : i32
    %70 = tpu.dynamic_rotate %41 by %c239_i32_37 dim 1 : vector<8x256xf32>, i32 -> vector<8x256xf32>
    %c8_38 = arith.constant 8 : index
    %c0_39 = arith.constant 0 : index
    %71 = vector.load %arg6[%c8_38, %c0_39] : memref<9x256xf32, #tpu.memory_space<vmem>>, vector<1x256xf32>
    %72 = vector.broadcast %71 : vector<1x256xf32> to vector<8x256xf32>
    %73 = arith.mulf %70, %72 : vector<8x256xf32>
    %74 = tpu.concatenate %45, %49, %53, %57, %41, %61, %65, %69, %73 in 0 : vector<8x256xf32>, vector<8x256xf32>, vector<8x256xf32>, vector<8x256xf32>, vector<8x256xf32>, vector<8x256xf32>, vector<8x256xf32>, vector<8x256xf32>, vector<8x256xf32> -> vector<72x256xf32>
    %c0_40 = arith.constant 0 : index
    %c0_41 = arith.constant 0 : index
    %75 = vector.load %arg4[%c0_40, %c0_41] : memref<16x72xf32, #tpu.memory_space<vmem>>, vector<16x72xf32>
    %cst_42 = arith.constant dense<0.000000e+00> : vector<16x256xf32>
    %76 = tpu.matmul %75, %74, %cst_42 {dimension_numbers = #tpu.dot_dimension_numbers<[1], [0], [0], [1], [0, 0, 1, 1], [], []>} : vector<16x72xf32>, vector<72x256xf32>, vector<16x256xf32> -> vector<16x256xf32>
    %c0_43 = arith.constant 0 : index
    %c0_44 = arith.constant 0 : index
    %77 = vector.load %arg5[%c0_43, %c0_44] : memref<16x1xf32, #tpu.memory_space<vmem>>, vector<16x1xf32>
    %78 = vector.broadcast %77 : vector<16x1xf32> to vector<16x256xf32>
    %79 = arith.addf %76, %78 : vector<16x256xf32>
    %cst_45 = arith.constant 0.000000e+00 : f32
    %80 = vector.broadcast %cst_45 : f32 to vector<16x256xf32>
    %81 = arith.maximumf %79, %80 : vector<16x256xf32>
    %c0_46 = arith.constant 0 : index
    %c0_47 = arith.constant 0 : index
    %c0_48 = arith.constant 0 : index
    %82 = vector.load %arg7[%c0_46, %c0_47, %c0_48] : memref<1x16x256xf32, #tpu.memory_space<vmem>>, vector<1x16x256xf32>
    %83 = vector.shape_cast %82 : vector<1x16x256xf32> to vector<16x256xf32>
    %84 = vector.shape_cast %81 : vector<16x256xf32> to vector<1x16x256xf32>
    tpu.vector_store %arg7[%c0_46, %c0_47, %c0_48], %84 {strides = array<i32>} : memref<1x16x256xf32, #tpu.memory_space<vmem>>, vector<1x16x256xf32>,
    return
  }
  func.func @transform_0(%arg0: i32) -> (i32, i32, i32) {
    %c0_i32 = arith.constant 0 : i32
    %c0_i32_0 = arith.constant 0 : i32
    %c0_i32_1 = arith.constant 0 : i32
    return %arg0, %c0_i32, %c0_i32_0 : i32, i32, i32
  }
  func.func @transform_1(%arg0: i32) -> (i32, i32) {
    %c0_i32 = arith.constant 0 : i32
    %c0_i32_0 = arith.constant 0 : i32
    %c0_i32_1 = arith.constant 0 : i32
    return %c0_i32, %c0_i32_0 : i32, i32
  }
  func.func @transform_2(%arg0: i32) -> (i32, i32) {
    %c0_i32 = arith.constant 0 : i32
    %c0_i32_0 = arith.constant 0 : i32
    %c0_i32_1 = arith.constant 0 : i32
    return %c0_i32, %c0_i32_0 : i32, i32
  }
  func.func @transform_3(%arg0: i32) -> (i32, i32) {
    %c0_i32 = arith.constant 0 : i32
    %c0_i32_0 = arith.constant 0 : i32
    %c0_i32_1 = arith.constant 0 : i32
    return %c0_i32, %c0_i32_0 : i32, i32
  }
  func.func @transform_4(%arg0: i32) -> (i32, i32) {
    %c0_i32 = arith.constant 0 : i32
    %c0_i32_0 = arith.constant 0 : i32
    %c0_i32_1 = arith.constant 0 : i32
    return %c0_i32, %c0_i32_0 : i32, i32
  }
  func.func @transform_5(%arg0: i32) -> (i32, i32) {
    %c0_i32 = arith.constant 0 : i32
    %c0_i32_0 = arith.constant 0 : i32
    %c0_i32_1 = arith.constant 0 : i32
    return %c0_i32, %c0_i32_0 : i32, i32
  }
  func.func @transform_6(%arg0: i32) -> (i32, i32, i32) {
    %c0_i32 = arith.constant 0 : i32
    %c0_i32_0 = arith.constant 0 : i32
    %c0_i32_1 = arith.constant 0 : i32
    return %arg0, %c0_i32, %c0_i32_0 : i32, i32, i32
  }
}

</mosaic_0001>

<bundles_post_ra>
// kernel: featnet_forward.1
= control target key start
LH: loop header
LB: loop body
LE: loop exit
PB: predicated region body
PF: predicated region fallthrough
CT: control target
= control target key end

     0   :  { %s867_s21 = smov 0   ;;  %s1159_s0 = inlined_call_operand.vmem [shape: f32[2,8,256], index: 0, kind: input, shape index: {}]   ;;  %s1160_s1 = inlined_call_operand.vmem [shape: f32[8,72], index: 1, kind: input, shape index: {}]   ;;  %s1161_s2 = inlined_call_operand.vmem [shape: f32[8,1], index: 2, kind: input, shape index: {}]   ;;  %s1162_s3 = inlined_call_operand.vmem [shape: f32[16,72], index: 3, kind: input, shape index: {}]   ;;  %s1163_s4 = inlined_call_operand.vmem [shape: f32[16,1], index: 4, kind: input, shape index: {}]   ;;  %s1164_s5 = inlined_call_operand.vmem [shape: f32[9,256], index: 5, kind: input, shape index: {}]   ;;  %s1165_s6 = inlined_call_operand.vmem [shape: f32[2,16,256], index: 6, kind: output, shape index: {}]  }
   0x1 LB: > { %s739_s22 = sadd.s32 4294967295, %s820_s21   ;;  %p743_p0 = scmp.ge.s32.totalorder %s820_s21, 1  ;;  %s820_s21 = sphi %s867_s21, %s16_s21  }
   0x2   : > { %p212_p1 = scmp.lt.s32.totalorder %s820_s21, 3 }
   0x4   : > { %p213_p2 = pnand %p743_p0, %p212_p1 }
   0x5   : > { %p242_p3 = scmp.lt.s32.totalorder (!%p213_p2), %s739_s22, 1  ;;  %s822_s27 = smov (!%p213_p2), 16   ;;  %v828_v2 = vmov (!%p213_p2), 0.0   ;;  %v829_v3 = vmov (!%p213_p2), 0   ;;  %v432_v4 = vld [vmem:[%s1161_s2] sm:$0xff] (!%p213_p2)  ;;  %v258_v5 = vlaneseq (!%p213_p2)  ;;  %vm438_vm8 = vcmask (!%p213_p2), 588800  }
   0x6   : > { %216 = sbr.rel (%p213_p2) target bundleno = 759 (0x2f7), region = 44  ;;  %s823_s28 = smov (!%p213_p2), 17   ;;  %506 = vmatprep.mubr.f32.mxu0 (!%p213_p2), %v828_v2  ;;  %663 = vmatprep.mubr.f32.mxu1 (!%p213_p2), %v828_v2  ;;  %v748_v10 = vld [vmem:[%s1164_s5 + $0x1] ss:$8 sm:$0x3] (!%p213_p2) }
   0x7   : > { %s824_s29 = smov (!%p213_p2), 15   ;;  %s825_s30 = smov (!%p213_p2), 1   ;;  %812 = vset.pattern.permute.xlu0 (!%p213_p2), %v829_v3  ;;  %813 = vset.pattern.permute.xlu1 (!%p213_p2), %v829_v3  ;;  %v266_v6 = vshrl.u32 (!%p213_p2), %v258_v5, 7  ;;  %v922_v7 = vand.u32 (!%p213_p2), 127, %v258_v5 }
   0x8   : > { %s826_s7 = smov (!%p213_p2), 127   ;;  %s827_s8 = smov (!%p213_p2), 113   ;;  %v263_v11 = vld [vmem:[%s1164_s5] ss:$8 sm:$0x3] (!%p213_p2) }
   0x9   : > { %s830_s9 = smov (!%p213_p2), 112   ;;  %s831_s10 = smov (!%p213_p2), 111   ;;  %v924_v8 = vsub.s32 (!%p213_p2), 0, %v266_v6  ;;  %v926_v9 = vsub.s32 (!%p213_p2), 1, %v266_v6  ;;  %vm281_vm0 = vcmp.lt.s32.totalorder (!%p213_p2), %v922_v7, 16  ;;  %vm260_vm1 = vcmp.lt.s32.totalorder (!%p213_p2), %v922_v7, 17 }
   0xa   : > { %v749_v28 = vld [vmem:[%s1164_s5 + $0x2] ss:$8 sm:$0x3] (!%p213_p2)  ;;  %v750_v29 = vld [vmem:[%s1164_s5 + $0x3] ss:$8 sm:$0x3] (!%p213_p2) }
   0xb   : > { %v937_v14 = vrot.slane (!%p213_p2), %v748_v10, %v924_v8  ;;  %v940_v15 = vrot.slane (!%p213_p2), %v263_v11, %v924_v8  ;;  %v943_v16 = vrot.slane (!%p213_p2), %v263_v11, %v926_v9  ;;  %v946_v17 = vrot.slane (!%p213_p2), %v748_v10, %v926_v9  ;;  %v751_v38 = vld [vmem:[%s1164_s5 + $0x5] ss:$8 sm:$0x3] (!%p213_p2)  ;;  %v752_v59 = vld [vmem:[%s1164_s5 + $0x6] ss:$8 sm:$0x3] (!%p213_p2) }
   0xc   : > { %vm303_vm2 = vcmp.lt.s32.totalorder (!%p213_p2), %v922_v7, 15  ;;  %vm325_vm3 = vcmp.lt.s32.totalorder (!%p213_p2), %v922_v7, 1  ;;  %v969_v34 = vrot.slane (!%p213_p2), %v749_v28, %v924_v8  ;;  %v972_v35 = vrot.slane (!%p213_p2), %v749_v28, %v926_v9  ;;  %v753_v60 = vld [vmem:[%s1164_s5 + $0x7] ss:$8 sm:$0x3] (!%p213_p2) }
   0xd   : > { %s1167_s22 = smov (!%p242_p3, %s739_s22), 1  ;;  %v975_v36 = vrot.slane %v750_v29, %v924_v8  ;;  %v978_v37 = vrot.slane %v750_v29, %v926_v9  ;;  %vm347_vm4 = vcmp.lt.s32.totalorder %v922_v7, 127  ;;  %v993_v45 = vrot.slane %v751_v38, %v924_v8 }
   0xe   : > { %s760_s23 = sshll.u32 %s1167_s22, 4  ;;  %v996_v46 = vrot.slane %v751_v38, %v926_v9  ;;  %vm369_vm5 = vcmp.lt.s32.totalorder %v922_v7, 113  ;;  %v1021_v5 = vrot.slane %v752_v59, %v926_v9  ;;  %vm391_vm6 = vcmp.lt.s32.totalorder %v922_v7, 112  ;;  %s761_s17 = sshll.u32 %s1167_s22, 5 }
   0xf   : > { %s246_s26 = scalar_lea.vmem %s1159_s0, %s760_s23  ;;  %v1025_v6 = vrot.slane %v753_v60, %v924_v8  ;;  %v1028_v10 = vrot.slane %v753_v60, %v926_v9  ;;  %vm413_vm7 = vcmp.lt.s32.totalorder %v922_v7, 111  ;;  %v580_v7 = vld [vmem:[%s1162_s3 + $0x8] sm:$0xff]  ;;  %s251_s20 = scalar_lea.vmem %s1165_s6, %s761_s17 }
  0x10   : > { %v881_v0 = vld [vmem:[%s246_s26] sm:$0xff]  ;;  %v887_v1 = vld [vmem:[%s246_s26 + $0x8] sm:$0xff] }
  0x11   : > { %277 = vrot.lane.b32.xlu1 %v881_v0, %s822_s27  ;;  %254 = vrot.lane.b32.xlu0 %v881_v0, %s823_s28 }
  0x15   : > { %279 = vrot.lane.b32.xlu1 %v887_v1, %s822_s27  ;;  %256 = vrot.lane.b32.xlu0 %v887_v1, %s823_s28 }
  0x19   : > { %301 = vrot.lane.b32.xlu1 %v887_v1, %s824_s29  ;;  %299 = vrot.lane.b32.xlu0 %v881_v0, %s824_s29 }
  0x1d   : > { %323 = vrot.lane.b32.xlu1 %v887_v1, %s825_s30  ;;  %321 = vrot.lane.b32.xlu0 %v881_v0, %s825_s30 }
  0x21   : > { %345 = vrot.lane.b32.xlu1 %v887_v1, %s826_s7  ;;  %343 = vrot.lane.b32.xlu0 %v881_v0, %s826_s7 }
  0x25   : > { %367 = vrot.lane.b32.xlu1 %v887_v1, %s827_s8  ;;  %365 = vrot.lane.b32.xlu0 %v881_v0, %s827_s8 }
  0x29   : > { %389 = vrot.lane.b32.xlu1 %v887_v1, %s830_s9  ;;  %387 = vrot.lane.b32.xlu0 %v881_v0, %s830_s9 }
  0x2d   : > { %411 = vrot.lane.b32.xlu1 %v887_v1, %s831_s10  ;;  %409 = vrot.lane.b32.xlu0 %v881_v0, %s831_s10 }
  0x31   : > { %435 = vperm.xlu0 %812, %v432_v4   ;;  %v1018_v4 = vrot.slane %v752_v59, %v924_v8 }
  0x83   : > { %v278_v12 = vpop.permute.xlu1 %277  ;;  %v255_v13 = vpop.permute.xlu0 %254 }
  0x87   : > { %v280_v18 = vpop.permute.xlu1 %279  ;;  %v257_v19 = vpop.permute.xlu0 %256 }
  0x88   : > { %v282_v20 = vsel %vm281_vm0, %v278_v12, %v280_v18  ;;  %v283_v21 = vsel %vm281_vm0, %v280_v18, %v278_v12  ;;  %v261_v22 = vsel %vm260_vm1, %v255_v13, %v257_v19  ;;  %v262_v23 = vsel %vm260_vm1, %v257_v19, %v255_v13 }
  0x89   : > { %v297_v24 = vmul.f32 %v937_v14, %v283_v21  ;;  %v275_v25 = vmul.f32 %v940_v15, %v262_v23  ;;  %v276_v26 = vmul.f32 %v943_v16, %v261_v22  ;;  %v298_v27 = vmul.f32 %v946_v17, %v282_v20 }
  0x8b   : > { %v302_v30 = vpop.permute.xlu1 %301  ;;  %v300_v31 = vpop.permute.xlu0 %299  ;;  %v762_v32 = vpack.c.bf16 %v298_v27, %v276_v26  ;;  %v764_v33 = vpack.c.bf16 %v297_v24, %v275_v25 }
  0x8c   : > { %v304_v39 = vsel %vm303_vm2, %v300_v31, %v302_v30  ;;  %v305_v40 = vsel %vm303_vm2, %v302_v30, %v300_v31 }
  0x8d   : > { %763 = vmatprep.subr.bf16.mxu0 %v762_v32  ;;  %v319_v47 = vmul.f32 %v969_v34, %v305_v40  ;;  %v320_v48 = vmul.f32 %v972_v35, %v304_v39 }
  0x8e   : > { %765 = vmatpush1.bf16.msra.mxu0 %v764_v33 }
  0x8f   : > { %v324_v41 = vpop.permute.xlu1 %323  ;;  %v322_v42 = vpop.permute.xlu0 %321 }
  0x90   : > { %v326_v43 = vsel %vm325_vm3, %v322_v42, %v324_v41  ;;  %v327_v44 = vsel %vm325_vm3, %v324_v41, %v322_v42 }
  0x91   : > { %v341_v49 = vmul.f32 %v975_v36, %v327_v44  ;;  %v342_v50 = vmul.f32 %v978_v37, %v326_v43  ;;  %v581_v44 = vld [vmem:[%s1163_s4] sm:$0xff] }
  0x93   : > { %v346_v51 = vpop.permute.xlu1 %345  ;;  %v344_v52 = vpop.permute.xlu0 %343  ;;  %v766_v53 = vpack.c.bf16 %v342_v50, %v320_v48  ;;  %v768_v54 = vpack.c.bf16 %v341_v49, %v319_v47  ;;  %v582_v47 = vld [vmem:[%s1163_s4 + $0x8] sm:$0xff] }
  0x94   : > { %v348_v55 = vsel %vm347_vm4, %v344_v52, %v346_v51  ;;  %v349_v56 = vsel %vm347_vm4, %v346_v51, %v344_v52 }
  0x95   : > { %v363_v57 = vmul.f32 %v993_v45, %v348_v55  ;;  %v364_v58 = vmul.f32 %v996_v46, %v349_v56  ;;  %767 = vmatprep.subr.bf16.mxu0 %v766_v53 }
  0x96   : > { %769 = vmatpush1.bf16.msra.mxu0 %v768_v54 }
  0x97   : > { %v368_v61 = vpop.permute.xlu1 %367  ;;  %v366_v62 = vpop.permute.xlu0 %365  ;;  %v770_v63 = vpack.c.bf16 %v364_v58, %v887_v1  ;;  %v772_v3 = vpack.c.bf16 %v363_v57, %v881_v0  ;;  %v754_v1 = vld [vmem:[%s1164_s5 + $0x10] ss:$8 sm:$0x3] }
  0x98   : > { %v370_v0 = vsel %vm369_vm5, %v366_v62, %v368_v61  ;;  %v371_v11 = vsel %vm369_vm5, %v368_v61, %v366_v62  ;;  %v1043_v20 = vrot.slane %v754_v1, %v926_v9  ;;  %v1050_v25 = vrot.slane %v754_v1, %v924_v8  ;;  %v431_v8 = vld [vmem:[%s1160_s1] sm:$0xff] }
  0x99   : > { %771 = vmatprep.subr.bf16.mxu0 %v770_v63  ;;  %v385_v21 = vmul.f32 %v1018_v4, %v370_v0  ;;  %v386_v22 = vmul.f32 %v1021_v5, %v371_v11 }
  0x9a   : > { %773 = vmatpush1.bf16.msra.mxu0 %v772_v3 }
  0x9b   : > { %v390_v12 = vpop.permute.xlu1 %389  ;;  %v388_v13 = vpop.permute.xlu0 %387 }
  0x9c   : > { %v392_v18 = vsel %vm391_vm6, %v388_v13, %v390_v12  ;;  %v393_v19 = vsel %vm391_vm6, %v390_v12, %v388_v13 }
  0x9d   : > { %v407_v23 = vmul.f32 %v1025_v6, %v392_v18  ;;  %v408_v24 = vmul.f32 %v1028_v10, %v393_v19 }
  0x9f   : > { %v412_v26 = vpop.permute.xlu1 %411  ;;  %v774_v27 = vpack.c.bf16 %v408_v24, %v386_v22  ;;  %v410_v28 = vpop.permute.xlu0 %409  ;;  %v776_v29 = vpack.c.bf16 %v407_v23, %v385_v21 }
  0xa0   : > { %v414_v30 = vsel %vm413_vm7, %v410_v28, %v412_v26  ;;  %v415_v9 = vsel %vm413_vm7, %v412_v26, %v410_v28 }
  0xa1   : > { %775 = vmatprep.subr.bf16.mxu0 %v774_v27  ;;  %v430_v31 = vmul.f32 %v1043_v20, %v415_v9  ;;  %v429_v32 = vmul.f32 %v1050_v25, %v414_v30 }
  0xa2   : > { %777 = vmatpush1.bf16.msra.mxu0 %v776_v29 }
  0xa3   : > { %458 = vmatprep.subr.mxu0 %v430_v31 }
  0xa6   : > { %459 = vmatpush1.msra.mxu0 %v429_v32 }
  0xa7   : > { %755 = vmatmul.mubr.msk.f32.vlgmr.msra.gmra.mrb[0].mxu0 %vm438_vm8, %v431_v8 }
  0xb0   : > { %v436_v33 = vpop.permute.xlu0 %435 }
 0x17a   : > { %v508_v38 = vpop.f32.mrb[0].mxu0 }
 0x17b   : > { %v509_v39 = vadd.f32 %v508_v38, %v436_v33  ;;  %v510_v40 = vpop.f32.mrb[1].mxu0 }
 0x17c   : > { %v511_v42 = vadd.f32 %v510_v40, %v436_v33 }
 0x17d   : > { %v1062_v41 = vmax.f32 %v509_v39, 0.0 }
 0x17e   : > { %v514_v43 = vmax.f32 %v511_v42, 0.0 }
 0x17f   : > { %523 = vrot.lane.b32.xlu0 %v1062_v41, %s822_s27  ;;  %515 = vrot.lane.b32.xlu1 %v1062_v41, %s823_s28 }
 0x183   : > { %531 = vrot.lane.b32.xlu0 %v1062_v41, %s824_s29  ;;  %517 = vrot.lane.b32.xlu1 %v514_v43, %s823_s28 }
 0x187   : > { %539 = vrot.lane.b32.xlu0 %v1062_v41, %s825_s30  ;;  %525 = vrot.lane.b32.xlu1 %v514_v43, %s822_s27 }
 0x18b   : > { %547 = vrot.lane.b32.xlu0 %v1062_v41, %s826_s7  ;;  %533 = vrot.lane.b32.xlu1 %v514_v43, %s824_s29 }
 0x18f   : > { %555 = vrot.lane.b32.xlu0 %v1062_v41, %s827_s8  ;;  %541 = vrot.lane.b32.xlu1 %v514_v43, %s825_s30 }
 0x193   : > { %563 = vrot.lane.b32.xlu0 %v1062_v41, %s830_s9  ;;  %549 = vrot.lane.b32.xlu1 %v514_v43, %s826_s7 }
 0x197   : > { %571 = vrot.lane.b32.xlu0 %v1062_v41, %s831_s10  ;;  %557 = vrot.lane.b32.xlu1 %v514_v43, %s827_s8 }
 0x19b   : > { %585 = vperm.xlu0 %812, %v581_v44   ;;  %565 = vrot.lane.b32.xlu1 %v514_v43, %s830_s9 }
 0x19f   : > { %573 = vrot.lane.b32.xlu1 %v514_v43, %s831_s10 }
 0x1a3   : > { %590 = vperm.xlu1 %813, %v582_v47  }
 0x1f1   : > { %v524_v48 = vpop.permute.xlu0 %523  ;;  %v516_v49 = vpop.permute.xlu1 %515 }
 0x1f5   : > { %v532_v50 = vpop.permute.xlu0 %531  ;;  %v518_v51 = vpop.permute.xlu1 %517 }
 0x1f6   : > { %v519_v52 = vsel %vm260_vm1, %v516_v49, %v518_v51  ;;  %v520_v53 = vsel %vm260_vm1, %v518_v51, %v516_v49 }
 0x1f7   : > { %v521_v58 = vmul.f32 %v520_v53, %v940_v15  ;;  %v522_v60 = vmul.f32 %v519_v52, %v943_v16 }
 0x1f9   : > { %v540_v54 = vpop.permute.xlu0 %539  ;;  %v526_v55 = vpop.permute.xlu1 %525 }
 0x1fa   : > { %v527_v56 = vsel %vm281_vm0, %v524_v48, %v526_v55  ;;  %v528_v57 = vsel %vm281_vm0, %v526_v55, %v524_v48 }
 0x1fb   : > { %v529_v59 = vmul.f32 %v528_v57, %v937_v14  ;;  %v530_v61 = vmul.f32 %v527_v56, %v946_v17 }
 0x1fd   : > { %v534_v62 = vpop.permute.xlu1 %533  ;;  %v778_v63 = vpack.c.bf16 %v530_v61, %v522_v60  ;;  %v780_v3 = vpack.c.bf16 %v529_v59, %v521_v58  ;;  %v548_v1 = vpop.permute.xlu0 %547 }
 0x1fe   : > { %v535_v0 = vsel %vm303_vm2, %v532_v50, %v534_v62  ;;  %v536_v11 = vsel %vm303_vm2, %v534_v62, %v532_v50 }
 0x1ff   : > { %779 = vmatprep.subr.bf16.mxu1 %v778_v63  ;;  %v537_v16 = vmul.f32 %v536_v11, %v969_v34  ;;  %v538_v17 = vmul.f32 %v535_v0, %v972_v35 }
 0x200   : > { %781 = vmatpush1.bf16.msra.mxu1 %v780_v3 }
 0x201   : > { %v542_v12 = vpop.permute.xlu1 %541  ;;  %v556_v19 = vpop.permute.xlu0 %555 }
 0x202   : > { %v543_v14 = vsel %vm325_vm3, %v540_v54, %v542_v12  ;;  %v544_v15 = vsel %vm325_vm3, %v542_v12, %v540_v54 }
 0x203   : > { %v545_v13 = vmul.f32 %v544_v15, %v975_v36  ;;  %v546_v18 = vmul.f32 %v543_v14, %v978_v37 }
 0x205   : > { %v550_v21 = vpop.permute.xlu1 %549  ;;  %v782_v22 = vpack.c.bf16 %v546_v18, %v538_v17  ;;  %v784_v23 = vpack.c.bf16 %v545_v13, %v537_v16  ;;  %v564_v28 = vpop.permute.xlu0 %563 }
 0x206   : > { %v551_v24 = vsel %vm347_vm4, %v548_v1, %v550_v21  ;;  %v552_v26 = vsel %vm347_vm4, %v550_v21, %v548_v1 }
 0x207   : > { %v553_v27 = vmul.f32 %v551_v24, %v993_v45  ;;  %v554_v34 = vmul.f32 %v552_v26, %v996_v46  ;;  %783 = vmatprep.subr.bf16.mxu1 %v782_v22 }
 0x208   : > { %785 = vmatpush1.bf16.msra.mxu1 %v784_v23 }
 0x209   : > { %v558_v35 = vpop.permute.xlu1 %557  ;;  %v786_v36 = vpack.c.bf16 %v554_v34, %v514_v43  ;;  %v788_v37 = vpack.c.bf16 %v553_v27, %v1062_v41  ;;  %v572_v38 = vpop.permute.xlu0 %571 }
 0x20a   : > { %v559_v29 = vsel %vm369_vm5, %v556_v19, %v558_v35  ;;  %v560_v30 = vsel %vm369_vm5, %v558_v35, %v556_v19 }
 0x20b   : > { %787 = vmatprep.subr.bf16.mxu1 %v786_v36  ;;  %v561_v31 = vmul.f32 %v559_v29, %v1018_v4  ;;  %v562_v32 = vmul.f32 %v560_v30, %v1021_v5  ;;  %v579_v5 = vld [vmem:[%s1162_s3] sm:$0xff] }
 0x20c   : > { %789 = vmatpush1.bf16.msra.mxu1 %v788_v37 }
 0x20d   : > { %v566_v9 = vpop.permute.xlu1 %565 }
 0x20e   : > { %v567_v45 = vsel %vm391_vm6, %v564_v28, %v566_v9  ;;  %v568_v46 = vsel %vm391_vm6, %v566_v9, %v564_v28 }
 0x20f   : > { %v569_v8 = vmul.f32 %v567_v45, %v1025_v6  ;;  %v570_v33 = vmul.f32 %v568_v46, %v1028_v10 }
 0x211   : > { %v574_v39 = vpop.permute.xlu1 %573  ;;  %v790_v40 = vpack.c.bf16 %v570_v33, %v562_v32  ;;  %v792_v41 = vpack.c.bf16 %v569_v8, %v561_v31 }
 0x212   : > { %v576_v42 = vsel %vm413_vm7, %v574_v39, %v572_v38  ;;  %v575_v43 = vsel %vm413_vm7, %v572_v38, %v574_v39 }
 0x213   : > { %v578_v44 = vmul.f32 %v576_v42, %v1043_v20  ;;  %791 = vmatprep.subr.bf16.mxu1 %v790_v40  ;;  %v577_v4 = vmul.f32 %v575_v43, %v1050_v25 }
 0x214   : > { %793 = vmatpush1.bf16.msra.mxu1 %v792_v41 }
 0x215   : > { %615 = vmatprep.subr.mxu1 %v578_v44 }
 0x218   : > { %616 = vmatpush1.msra.mxu1 %v577_v4 }
 0x219   : > { %756 = vmatmul.mubr.msk.f32.vlgmr.msra.gmra.mrb[0].mxu1 %vm438_vm8, %v579_v5 }
 0x21a   : > { %669 = vmatprep.mubr.f32.mxu1 %v828_v2  ;;  %v586_v6 = vpop.permute.xlu0 %585 }
 0x21d   : > { %757 = vmatmul.mubr.msk.f32.gmra.mrb[2].mxu1 %vm438_vm8, %v580_v7 }
 0x222   : > { %v591_v48 = vpop.permute.xlu1 %590 }
 0x2ec   : > { %v665_v10 = vpop.f32.mrb[0].mxu1 }
 0x2ed   : > { %v666_v20 = vadd.f32 %v665_v10, %v586_v6  ;;  %v667_v25 = vpop.f32.mrb[1].mxu1 }
 0x2ee   : > { %v668_v47 = vadd.f32 %v667_v25, %v586_v6 }
 0x2ef   : > { %v676_v49 = vmax.f32 %v666_v20, 0.0 }
 0x2f0   : > { %v677_v50 = vmax.f32 %v668_v47, 0.0  ;;  %v671_v2 = vpop.f32.mrb[2].mxu1 }
 0x2f1   : > { %680 = vst [vmem:[%s251_s20] sm:$0xff] %v676_v49  ;;  %v672_v51 = vadd.f32 %v671_v2, %v591_v48  ;;  %v673_v52 = vpop.f32.mrb[3].mxu1 }
 0x2f2   : > { %681 = vst [vmem:[%s251_s20 + $0x8] sm:$0xff] %v677_v50  ;;  %v674_v53 = vadd.f32 %v673_v52, %v591_v48 }
 0x2f3   : > { %v678_v54 = vmax.f32 %v672_v51, 0.0 }
 0x2f4   : > { %v679_v55 = vmax.f32 %v674_v53, 0.0 }
 0x2f5   : > { %682 = vst [vmem:[%s251_s20 + $0x10] sm:$0xff] %v678_v54 }
 0x2f6   : > { %683 = vst [vmem:[%s251_s20 + $0x18] sm:$0xff] %v679_v55 }
 0x2f7 PF: > { %s16_s21 = sadd.s32 1, %s820_s21  }
 0x2f8   : > { %p13_p4 = scmp.ge.s32.totalorder %s16_s21, 4  }
 0x2fa   :  { %15 = sbr.rel (!%p13_p4) target bundleno = 1 (0x1), region = 81 }

</bundles_post_ra>
